<compile_context>
chip_gen: v7x
topology: tpu7x:2x2x1
jax: 0.10.0
libtpu: 0.0.40
codegen_flags: <defaults>
</compile_context>

<pallas_src>
import functools
import math

import jax
import jax.numpy as jnp
from jax.experimental import pallas as pl
from jax.experimental.pallas import tpu as pltpu


def _sdpa_kernel(q_ref, k_ref, v_ref, ctx_ref, attn_ref, *, scale):
    """One (batch, q-tile) step.

    q_ref   : [1, TQ,  D]   query tile
    k_ref   : [1, L_k, D]   full keys for this batch (resident across q tiles)
    v_ref   : [1, L_k, D]   full values for this batch
    ctx_ref : [1, TQ,  D]   context output tile
    attn_ref: [1, TQ, L_k]  attention-weights output tile
    """
    q = q_ref[0]          # [TQ, D]
    k = k_ref[0]          # [L_k, D]
    v = v_ref[0]          # [L_k, D]

    # scores = q @ k^T  (MXU, f32 accumulation)
    s = jnp.dot(q, k.T, preferred_element_type=jnp.float32)   # [TQ, L_k]
    if scale is not None:
        s = s * scale

    # numerically stable softmax over the key axis
    m = jnp.max(s, axis=-1, keepdims=True)
    e = jnp.exp(s - m)
    p = e / jnp.sum(e, axis=-1, keepdims=True)                 # [TQ, L_k]

    attn_ref[0] = p.astype(attn_ref.dtype)

    # context = attention @ v  (MXU)
    ctx = jnp.dot(p.astype(v.dtype), v, preferred_element_type=jnp.float32)
    ctx_ref[0] = ctx.astype(ctx_ref.dtype)


def scaled_dot_product_attention(q, k, v, scale=None):
    """q: [B, L_q, D], k: [B, L_k, D], v: [B, L_k, D_v] (here D_v == D).

    Returns (context [B, L_q, D_v], attention [B, L_q, L_k]).
    """
    B, Lq, D = q.shape
    _, Lk, Dv = v.shape
    assert k.shape == (B, Lk, D)

    # Query tile: 128 rows fills the MXU; fall back to full L_q if it is small.
    TQ = 128 if Lq % 128 == 0 else Lq
    grid = (B, Lq // TQ)

    kernel = functools.partial(_sdpa_kernel, scale=scale)

    ctx, attn = pl.pallas_call(
        kernel,
        out_shape=(
            jax.ShapeDtypeStruct((B, Lq, Dv), q.dtype),
            jax.ShapeDtypeStruct((B, Lq, Lk), q.dtype),
        ),
        grid_spec=pltpu.PrefetchScalarGridSpec(
            num_scalar_prefetch=0,
            grid=grid,
            in_specs=[
                pl.BlockSpec((1, TQ, D), lambda b, i: (b, i, 0)),   # q tile
                pl.BlockSpec((1, Lk, D), lambda b, i: (b, 0, 0)),   # k (resident)
                pl.BlockSpec((1, Lk, Dv), lambda b, i: (b, 0, 0)),  # v (resident)
            ],
            out_specs=[
                pl.BlockSpec((1, TQ, Dv), lambda b, i: (b, i, 0)),  # context
                pl.BlockSpec((1, TQ, Lk), lambda b, i: (b, i, 0)),  # attention
            ],
        ),
        compiler_params=pltpu.CompilerParams(
            dimension_semantics=("parallel", "parallel")),
    )(q, k, v)
    return ctx, attn


def reference_forward(q, k, v, scale=None):
    """Pure-JAX reference of the PyTorch forward (dropout p=0, no mask)."""
    attn = jnp.einsum('bqd,bkd->bqk', q, k)
    if scale is not None:
        attn = attn * scale
    attn = jax.nn.softmax(attn, axis=2)
    ctx = jnp.einsum('bqk,bkd->bqd', attn, v)
    return ctx, attn


if __name__ == "__main__":
    key = jax.random.PRNGKey(0)
    kq, kk, kv = jax.random.split(key, 3)

    # Small shapes consistent with the module: batched [B, L, D] q/k/v.
    B, Lq, Lk, D = 2, 256, 128, 64
    q = jax.random.normal(kq, (B, Lq, D), jnp.float32)
    k = jax.random.normal(kk, (B, Lk, D), jnp.float32)
    v = jax.random.normal(kv, (B, Lk, D), jnp.float32)
    scale = 1.0 / math.sqrt(D)

    ctx, attn = scaled_dot_product_attention(q, k, v, scale=scale)
    ctx, attn = jax.block_until_ready((ctx, attn))

    ref_ctx, ref_attn = reference_forward(q, k, v, scale)

    assert ctx.shape == (B, Lq, D) and attn.shape == (B, Lq, Lk)
    assert jnp.allclose(attn, ref_attn, atol=1e-5, rtol=1e-5)
    assert jnp.allclose(ctx, ref_ctx, atol=1e-5, rtol=1e-5)

    print("KERNEL_OK")
</pallas_src>

<mosaic_0001>
module attributes {stable_mosaic.version = 11 : i64} {
  func.func @_sdpa_kernel(%arg0: i32, %arg1: i32, %arg2: memref<1x128x64xf32, #tpu.memory_space<vmem>>, %arg3: memref<1x128x64xf32, #tpu.memory_space<vmem>>, %arg4: memref<1x128x64xf32, #tpu.memory_space<vmem>>, %arg5: memref<1x128x64xf32, #tpu.memory_space<vmem>>, %arg6: memref<1x128x128xf32, #tpu.memory_space<vmem>>) attributes {dimension_semantics = [#tpu.dimension_semantics<parallel>, #tpu.dimension_semantics<parallel>], iteration_bounds = array<i64: 2, 2>, scalar_prefetch = 0 : i64, scratch_operands = 0 : i64, tpu.core_type = #tpu.core_type<tc>, window_params = [{transform_indices = @transform_0, window_bounds = array<i64: 1, 128, 64>}, {transform_indices = @transform_1, window_bounds = array<i64: 1, 128, 64>}, {transform_indices = @transform_2, window_bounds = array<i64: 1, 128, 64>}, {transform_indices = @transform_3, window_bounds = array<i64: 1, 128, 64>}, {transform_indices = @transform_4, window_bounds = array<i64: 1, 128, 128>}]} {
    %c0 = arith.constant 0 : index
    %c0_0 = arith.constant 0 : index
    %c0_1 = arith.constant 0 : index
    %0 = vector.load %arg2[%c0, %c0_0, %c0_1] : memref<1x128x64xf32, #tpu.memory_space<vmem>>, vector<1x128x64xf32>
    %1 = vector.shape_cast %0 : vector<1x128x64xf32> to vector<128x64xf32>
    %c0_2 = arith.constant 0 : index
    %c0_3 = arith.constant 0 : index
    %c0_4 = arith.constant 0 : index
    %2 = vector.load %arg3[%c0_2, %c0_3, %c0_4] : memref<1x128x64xf32, #tpu.memory_space<vmem>>, vector<1x128x64xf32>
    %3 = vector.shape_cast %2 : vector<1x128x64xf32> to vector<128x64xf32>
    %c0_5 = arith.constant 0 : index
    %c0_6 = arith.constant 0 : index
    %c0_7 = arith.constant 0 : index
    %4 = vector.load %arg4[%c0_5, %c0_6, %c0_7] : memref<1x128x64xf32, #tpu.memory_space<vmem>>, vector<1x128x64xf32>
    %5 = vector.shape_cast %4 : vector<1x128x64xf32> to vector<128x64xf32>
    %6 = tpu.transpose %3, [1, 0] : vector<128x64xf32> -> vector<64x128xf32>
    %cst = arith.constant dense<0.000000e+00> : vector<128x128xf32>
    %7 = tpu.matmul %1, %6, %cst {dimension_numbers = #tpu.dot_dimension_numbers<[1], [0], [0], [1], [0, 0, 1, 1], [], []>} : vector<128x64xf32>, vector<64x128xf32>, vector<128x128xf32> -> vector<128x128xf32>
    %cst_8 = arith.constant 1.250000e-01 : f32
    %8 = vector.broadcast %cst_8 : f32 to vector<128x128xf32>
    %9 = arith.mulf %7, %8 : vector<128x128xf32>
    %cst_9 = arith.constant dense<0xFF800000> : vector<128xf32>
    %10 = vector.multi_reduction <maximumf>, %9, %cst_9 [1] : vector<128x128xf32> to vector<128xf32>
    %11 = vector.shape_cast %10 : vector<128xf32> to vector<128x1xf32>
    %12 = vector.broadcast %11 : vector<128x1xf32> to vector<128x128xf32>
    %13 = arith.subf %9, %12 : vector<128x128xf32>
    %14 = math.exp %13 : vector<128x128xf32>
    %cst_10 = arith.constant dense<0.000000e+00> : vector<128xf32>
    %15 = vector.multi_reduction <add>, %14, %cst_10 [1] : vector<128x128xf32> to vector<128xf32>
    %16 = vector.shape_cast %15 : vector<128xf32> to vector<128x1xf32>
    %17 = vector.broadcast %16 : vector<128x1xf32> to vector<128x128xf32>
    %18 = arith.divf %14, %17 : vector<128x128xf32>
    %c0_11 = arith.constant 0 : index
    %c0_12 = arith.constant 0 : index
    %c0_13 = arith.constant 0 : index
    %19 = vector.load %arg6[%c0_11, %c0_12, %c0_13] : memref<1x128x128xf32, #tpu.memory_space<vmem>>, vector<1x128x128xf32>
    %20 = vector.shape_cast %19 : vector<1x128x128xf32> to vector<128x128xf32>
    %21 = vector.shape_cast %18 : vector<128x128xf32> to vector<1x128x128xf32>
    tpu.vector_store %arg6[%c0_11, %c0_12, %c0_13], %21 {strides = array<i32>} : memref<1x128x128xf32, #tpu.memory_space<vmem>>, vector<1x128x128xf32>,
    %cst_14 = arith.constant dense<0.000000e+00> : vector<128x64xf32>
    %22 = tpu.matmul %18, %5, %cst_14 {dimension_numbers = #tpu.dot_dimension_numbers<[1], [0], [0], [1], [0, 0, 1, 1], [], []>} : vector<128x128xf32>, vector<128x64xf32>, vector<128x64xf32> -> vector<128x64xf32>
    %c0_15 = arith.constant 0 : index
    %c0_16 = arith.constant 0 : index
    %c0_17 = arith.constant 0 : index
    %23 = vector.load %arg5[%c0_15, %c0_16, %c0_17] : memref<1x128x64xf32, #tpu.memory_space<vmem>>, vector<1x128x64xf32>
    %24 = vector.shape_cast %23 : vector<1x128x64xf32> to vector<128x64xf32>
    %25 = vector.shape_cast %22 : vector<128x64xf32> to vector<1x128x64xf32>
    tpu.vector_store %arg5[%c0_15, %c0_16, %c0_17], %25 {strides = array<i32>} : memref<1x128x64xf32, #tpu.memory_space<vmem>>, vector<1x128x64xf32>,
    return
  }
  func.func @transform_0(%arg0: i32, %arg1: i32) -> (i32, i32, i32) {
    %c0_i32 = arith.constant 0 : i32
    %c0_i32_0 = arith.constant 0 : i32
    return %arg0, %arg1, %c0_i32 : i32, i32, i32
  }
  func.func @transform_1(%arg0: i32, %arg1: i32) -> (i32, i32, i32) {
    %c0_i32 = arith.constant 0 : i32
    %c0_i32_0 = arith.constant 0 : i32
    %c0_i32_1 = arith.constant 0 : i32
    return %arg0, %c0_i32, %c0_i32_0 : i32, i32, i32
  }
  func.func @transform_2(%arg0: i32, %arg1: i32) -> (i32, i32, i32) {
    %c0_i32 = arith.constant 0 : i32
    %c0_i32_0 = arith.constant 0 : i32
    %c0_i32_1 = arith.constant 0 : i32
    return %arg0, %c0_i32, %c0_i32_0 : i32, i32, i32
  }
  func.func @transform_3(%arg0: i32, %arg1: i32) -> (i32, i32, i32) {
    %c0_i32 = arith.constant 0 : i32
    %c0_i32_0 = arith.constant 0 : i32
    return %arg0, %arg1, %c0_i32 : i32, i32, i32
  }
  func.func @transform_4(%arg0: i32, %arg1: i32) -> (i32, i32, i32) {
    %c0_i32 = arith.constant 0 : i32
    %c0_i32_0 = arith.constant 0 : i32
    return %arg0, %arg1, %c0_i32 : i32, i32, i32
  }
}

</mosaic_0001>

<bundles_post_ra>
// kernel: tpu_custom_call.1
= control target key start
LH: loop header
LB: loop body
LE: loop exit
PB: predicated region body
PF: predicated region fallthrough
CT: control target
= control target key end

     0   :  { %10 = vsyncpa [#allocation3], 0  ;;  %s2123_s0 = inlined_call_operand.vmem [shape: f32[2,256,64], index: 0, kind: input, shape index: {}]   ;;  %s2124_s1 = inlined_call_operand.vmem [shape: f32[2,128,64], index: 1, kind: input, shape index: {}]   ;;  %s2125_s2 = inlined_call_operand.vmem [shape: f32[2,128,64], index: 2, kind: input, shape index: {}]   ;;  %s2126_s3 = inlined_call_operand.vmem [shape: f32[2,256,64], index: 3, kind: output, shape index: {0}]   ;;  %s2127_s4 = inlined_call_operand.hbm [shape: f32[2,256,128], index: 4, kind: output, shape index: {1}]  }
   0x1   :  { %12 = vsyncpa [#allocation3 + $0x1], 0  ;;  %s1663_s15 = smov 0   ;;  %s1665_s16 = smov 0  }
   0x2   :  { %s1667_s17 = smov 0   ;;  %s1669_s18 = smov 0  }
   0x3   :  { %s1671_s19 = smov 0   ;;  %s1673_s20 = smov 0  }
   0x4   :  { %s1675_s21 = smov 0   ;;  %s1677_s22 = smov 0  }
   0x5 LB: > { %s1090_s23 = sadd.s32 4294967295, %s1633_s22   ;;  %s1091_s24 = sadd.s32 4294967294, %s1633_s22   ;;  %s1633_s22 = sphi %s1677_s22, %s18_s22   ;;  %s1629_s21 = sphi %s1675_s21, %s2138_s21   ;;  %s1625_s20 = sphi %s1673_s20, %s2137_s20   ;;  %s1621_s19 = sphi %s1671_s19, %s2136_s19   ;;  %s1617_s18 = sphi %s1669_s18, %s2135_s18   ;;  %s1613_s17 = sphi %s1667_s17, %s2134_s17   ;;  %s1609_s16 = sphi %s1665_s16, %s2133_s16   ;;  %s1605_s15 = sphi %s1663_s15, %s2132_s15  }
   0x6   : > { %s27_s25 = sadd.s32 1, %s1625_s20  ;;  %s30_s26 = sadd.s32 1, %s1629_s21 }
   0x7   : > { %p28_p0 = scmp.ge.s32.totalorder %s27_s25, 2  ;;  %p157_p1 = scmp.ne.s32.totalorder %s1613_s17, %s1609_s16 }
   0x8   : > { %p158_p2 = scmp.eq.s32.totalorder %s1090_s23, 3  ;;  %p163_p5 = scmp.ne.s32.totalorder %s1609_s16, %s1605_s15 }
   0x9   : > { %s2140_s25 = smov (%p28_p0, %s27_s25), 0  ;;  %s2142_s26 = smov (!%p28_p0, %s30_s26), %s1629_s21 }
   0xa   : > { %s143_s27 = ssub.s32 %s1625_s20, %s2140_s25  ;;  %p1714_p3 = por %p158_p2, %p157_p1 }
   0xb   : > { %p32_p4 = scmp.ge.s32.totalorder %s2142_s26, 2  ;;  %p164_p6 = scmp.eq.s32.totalorder %s1091_s24, 3 }
   0xc   : > { %p1094_p7 = scmp.ge.s32.totalorder %s1633_s22, 1  ;;  %p211_p9 = scmp.lt.s32.totalorder %s1633_s22, 5 }
   0xd   : > { %s2144_s26 = smov (%p32_p4, %s2142_s26), 0  ;;  %p1723_p8 = por %p164_p6, %p163_p5 }
   0xe   : > { %s142_s30 = ssub.s32 %s1629_s21, %s2144_s26  ;;  %s147_s5 = sadd.s32 1, %s1613_s17 }
   0xf   : > { %s144_s6 = sor.u32 %s143_s27, %s142_s30  ;;  %p212_p10 = pnand %p1094_p7, %p211_p9 }
  0x10   : > { %p145_p11 = scmp.eq.s32.totalorder %s144_s6, 0  ;;  %p261_p12 = scmp.lt.s32.totalorder (!%p212_p10), %s1621_s19, 1  ;;  %vm339_vm0 = vcmask (!%p212_p10), 523264  }
  0x11   : > { %215 = sbr.rel (%p212_p10) target bundleno = 868 (0x364), region = 32  ;;  %s1736_s8 = sshll.u32 (!%p212_p10), %s1617_s18, 4  ;;  %vm1754_vm1 = vmpackc.low (!%p212_p10), %vm339_vm0, %vm339_vm0 }
  0x12   : > { %s1732_s7 = scalar_select %p145_p11, %s1613_s17, %s147_s5  }
  0x13   : > { %p263_p13 = scmp.lt.s32.totalorder (!%p212_p10), %s1736_s8, 31  ;;  %s1140_s14 = sshll.u32 (!%p212_p10), %s1621_s19, 5 }
  0x18   : > { %s1740_s9 = scalar_select %p261_p12, %s1621_s19, 1 }
  0x19   : > { %s264_s10 = scalar_select %p263_p13, %s1736_s8, 31 }
  0x1a   : > { %s1144_s11 = sshll.u32 %s1740_s9, 7  ;;  %s1097_s12 = sshll.u32 %s1740_s9, 5 }
  0x1b   : > { %s1750_s23 = scalar_lea.vmem %s2124_s1, %s1144_s11  ;;  %s1758_s18 = sadd.s32 %s1097_s12, %s264_s10 }
  0x1c   : > { %v307_v1 = vld [vmem:[%s1750_s23] sm:$0xff]  ;;  %v308_v2 = vld [vmem:[%s1750_s23 + $0x8] sm:$0xff]  ;;  %v309_v3 = vld [vmem:[%s1750_s23 + $0x10] sm:$0xff]  ;;  %s1098_s24 = sshll.u32 %s1758_s18, 3  ;;  %s1901_s12 = scalar_lea.vmem %s2125_s2, %s1144_s11 }
  0x1d   : > { %v1322_v4 = vpack.c.bf16 %v308_v2, %v307_v1  ;;  %v310_v5 = vld [vmem:[%s1750_s23 + $0x18] sm:$0xff]  ;;  %s1770_s5 = scalar_lea.vmem %s2123_s0, %s1098_s24  ;;  %v311_v8 = vld [vmem:[%s1750_s23 + $0x20] sm:$0xff]  ;;  %v312_v9 = vld [vmem:[%s1750_s23 + $0x28] sm:$0xff]  ;;  %s257_s9 = sand.u32 1, %s1609_s16  }
  0x1e   : > { %v1328_v6 = vpack.c.bf16 %v310_v5, %v309_v3  ;;  %v291_v7 = vld [vmem:[%s1770_s5] sm:$0xff]  ;;  %v1334_v10 = vpack.c.bf16 %v312_v9, %v311_v8  ;;  %v313_v11 = vld [vmem:[%s1750_s23 + $0x30] sm:$0xff]  ;;  %v314_v12 = vld [vmem:[%s1750_s23 + $0x38] sm:$0xff]  ;;  %s1095_s11 = sshll.u32 %s257_s9, 7  ;;  %s1635_s19 = smov [#allocation2]  }
  0x1f   : > { %1324 = vmatprep.subr.msk.bf16.mxu0 %vm1754_vm1, %v1322_v4  ;;  %1242 = vmatprep.mubr.msk.f32.mxu0 %vm339_vm0, %v291_v7  ;;  %v1340_v13 = vpack.c.bf16 %v314_v12, %v313_v11  ;;  %v315_v14 = vld [vmem:[%s1750_s23 + $0x40] sm:$0xff]  ;;  %v316_v15 = vld [vmem:[%s1750_s23 + $0x48] sm:$0xff]  ;;  %v317_v17 = vld [vmem:[%s1750_s23 + $0x50] sm:$0xff]  ;;  %s1987_s13 = scalar_lea.vmem [#allocation2], %s1095_s11 }
  0x20   : > { %1327 = vmatpush3.bf16.xpose.msk.msra.mxu0 %vm1754_vm1, %v1322_v4  ;;  %v1346_v16 = vpack.c.bf16 %v316_v15, %v315_v14  ;;  %v318_v18 = vld [vmem:[%s1750_s23 + $0x58] sm:$0xff]  ;;  %v319_v20 = vld [vmem:[%s1750_s23 + $0x60] sm:$0xff]  ;;  %v320_v21 = vld [vmem:[%s1750_s23 + $0x68] sm:$0xff]  ;;  %s947_s10 = sshll.u32 %s1987_s13, 4  ;;  %s2028_s10 = int_to_ptr.vmem [resolvable:$true] %s947_s10 }
  0x21   : > { %1330 = vmatprep.subr.msk.bf16.mxu0 %vm1754_vm1, %v1328_v6  ;;  %v1352_v19 = vpack.c.bf16 %v318_v18, %v317_v17  ;;  %v1358_v22 = vpack.c.bf16 %v320_v21, %v319_v20  ;;  %v321_v23 = vld [vmem:[%s1750_s23 + $0x70] sm:$0xff]  ;;  %v322_v24 = vld [vmem:[%s1750_s23 + $0x78] sm:$0xff]  ;;  %v292_v26 = vld [vmem:[%s1770_s5 + $0x8] sm:$0xff]  ;;  %s944_s23 = sadd.s32 %s1140_s14, %s1736_s8  ;;  %s1539_s11 = scalar_lea.vmem %s2028_s10, 2048 }
  0x22   : > { %v1364_v25 = vpack.c.bf16 %v322_v24, %v321_v23  ;;  %v293_v27 = vld [vmem:[%s1770_s5 + $0x10] sm:$0xff]  ;;  %v294_v28 = vld [vmem:[%s1770_s5 + $0x18] sm:$0xff]  ;;  %v295_v29 = vld [vmem:[%s1770_s5 + $0x20] sm:$0xff]  ;;  %s1141_s27 = sshll.u32 %s944_s23, 7  ;;  %p1540_p0 = scmp.ne.s32.totalorder %s2028_s10, %s1539_s11 }
  0x23   : > { %v296_v30 = vld [vmem:[%s1770_s5 + $0x28] sm:$0xff]  ;;  %v297_v31 = vld [vmem:[%s1770_s5 + $0x30] sm:$0xff]  ;;  %v298_v32 = vld [vmem:[%s1770_s5 + $0x38] sm:$0xff]  ;;  %s2025_s6 = scalar_lea.hbm %s2127_s4, %s1141_s27  ;;  %s1543_s8 = sshll.u32 %s1635_s19, 4  ;;  %s1544_s8 = int_to_ptr.vmem [resolvable:$false] %s1543_s8 }
  0x24   : > { %v299_v33 = vld [vmem:[%s1770_s5 + $0x40] sm:$0xff]  ;;  %v300_v34 = vld [vmem:[%s1770_s5 + $0x48] sm:$0xff]  ;;  %v301_v35 = vld [vmem:[%s1770_s5 + $0x50] sm:$0xff]  ;;  %p1541_p1 = pnand %p1540_p0, %p1714_p3  ;;  %s1545_s14 = scalar_lea.vmem %s1544_s8, 4096 }
  0x25   : > { %v302_v36 = vld [vmem:[%s1770_s5 + $0x58] sm:$0xff]  ;;  %v303_v37 = vld [vmem:[%s1770_s5 + $0x60] sm:$0xff]  ;;  %v304_v38 = vld [vmem:[%s1770_s5 + $0x68] sm:$0xff]  ;;  %p1546_p4 = scmp.lt.s32.totalorder %s2028_s10, %s1544_s8  ;;  %p1547_p5 = scmp.lt.s32.totalorder %s1545_s14, %s1539_s11 }
  0x26   : > { %v305_v39 = vld [vmem:[%s1770_s5 + $0x70] sm:$0xff]  ;;  %v306_v40 = vld [vmem:[%s1770_s5 + $0x78] sm:$0xff]  ;;  %v323_v9 = vld [vmem:[%s1901_s12] sm:$0xff]  ;;  %p1542_p2 = pneg %p1541_p1 }
  0x27   : > { %v325_v11 = vld [vmem:[%s1901_s12 + $0x10] sm:$0xff]  ;;  %v327_v15 = vld [vmem:[%s1901_s12 + $0x20] sm:$0xff]  ;;  %p1548_p6 = por %p1547_p5, %p1546_p4 }
  0x28   : > { %1333 = vmatpush3.bf16.xpose.msk.msra.mxu0 %vm1754_vm1, %v1328_v6  ;;  %v329_v18 = vld [vmem:[%s1901_s12 + $0x30] sm:$0xff] }
  0x29   : > { %1336 = vmatprep.subr.msk.bf16.mxu0 %vm1754_vm1, %v1334_v10  ;;  %p1549_p7 = pnand %p1548_p6, %p1542_p2 }
  0x30   : > { %1339 = vmatpush3.bf16.xpose.msk.msra.mxu0 %vm1754_vm1, %v1334_v10  ;;  %v324_v10 = vld [vmem:[%s1901_s12 + $0x8] sm:$0xff] }
  0x31   : > { %1342 = vmatprep.subr.msk.bf16.mxu0 %vm1754_vm1, %v1340_v13  ;;  %v1370_v12 = vpack.c.bf16 %v324_v10, %v323_v9 }
  0x33   : > { %1371 = vmatprep.subr.bf16.mxu1 %v1370_v12 }
  0x34   : > { %1373 = vmatpush3.bf16.msra.mxu1 %v1370_v12 }
  0x38   : > { %1345 = vmatpush3.bf16.xpose.msk.msra.mxu0 %vm1754_vm1, %v1340_v13  ;;  %v326_v13 = vld [vmem:[%s1901_s12 + $0x18] sm:$0xff] }
  0x39   : > { %1348 = vmatprep.subr.msk.bf16.mxu0 %vm1754_vm1, %v1346_v16  ;;  %v1374_v14 = vpack.c.bf16 %v326_v13, %v325_v11  ;;  %v332_v11 = vld [vmem:[%s1901_s12 + $0x48] sm:$0xff] }
  0x3b   : > { %1375 = vmatprep.subr.bf16.mxu1 %v1374_v14 }
  0x3c   : > { %1377 = vmatpush3.bf16.msra.mxu1 %v1374_v14 }
  0x40   : > { %1351 = vmatpush3.bf16.xpose.msk.msra.mxu0 %vm1754_vm1, %v1346_v16  ;;  %v328_v16 = vld [vmem:[%s1901_s12 + $0x28] sm:$0xff] }
  0x41   : > { %1354 = vmatprep.subr.msk.bf16.mxu0 %vm1754_vm1, %v1352_v19  ;;  %v1378_v17 = vpack.c.bf16 %v328_v16, %v327_v15 }
  0x43   : > { %1379 = vmatprep.subr.bf16.mxu1 %v1378_v17 }
  0x44   : > { %1381 = vmatpush3.bf16.msra.mxu1 %v1378_v17 }
  0x48   : > { %1357 = vmatpush3.bf16.xpose.msk.msra.mxu0 %vm1754_vm1, %v1352_v19  ;;  %v330_v19 = vld [vmem:[%s1901_s12 + $0x38] sm:$0xff] }
  0x49   : > { %1360 = vmatprep.subr.msk.bf16.mxu0 %vm1754_vm1, %v1358_v22  ;;  %v1382_v20 = vpack.c.bf16 %v330_v19, %v329_v18  ;;  %v334_v18 = vld [vmem:[%s1901_s12 + $0x58] sm:$0xff] }
  0x4b   : > { %1383 = vmatprep.subr.bf16.mxu1 %v1382_v20 }
  0x4c   : > { %1385 = vmatpush3.bf16.msra.mxu1 %v1382_v20 }
  0x50   : > { %1363 = vmatpush3.bf16.xpose.msk.msra.mxu0 %vm1754_vm1, %v1358_v22 }
  0x51   : > { %1366 = vmatprep.subr.msk.bf16.mxu0 %vm1754_vm1, %v1364_v25 }
  0x58   : > { %1369 = vmatpush3.bf16.xpose.msk.msra.mxu0 %vm1754_vm1, %v1364_v25 }
  0x5f   : > { %1243 = vmatmul.mubr.msk.f32.vlgmr.msra.gmra.mrb[0].mxu0 %vm339_vm0, %v292_v26 }
  0x60   : > { %1245 = vmatprep.mubr.msk.f32.mxu0 %vm339_vm0, %v293_v27 }
  0x63   : > { %1246 = vmatmul.mubr.msk.f32.gmra.mrb[2].mxu0 %vm339_vm0, %v294_v28 }
  0x64   : > { %1248 = vmatprep.mubr.msk.f32.mxu0 %vm339_vm0, %v295_v29 }
  0x67   : > { %1249 = vmatmul.mubr.msk.f32.gmra.mrb[4].mxu0 %vm339_vm0, %v296_v30 }
  0x68   : > { %1251 = vmatprep.mubr.msk.f32.mxu0 %vm339_vm0, %v297_v31 }
  0x6b   : > { %1252 = vmatmul.mubr.msk.f32.gmra.mrb[6].mxu0 %vm339_vm0, %v298_v32 }
  0x6c   : > { %1254 = vmatprep.mubr.msk.f32.mxu0 %vm339_vm0, %v299_v33 }
  0x6f   : > { %1255 = vmatmul.mubr.msk.f32.gmra.mrb[8].mxu0 %vm339_vm0, %v300_v34 }
  0x70   : > { %1257 = vmatprep.mubr.msk.f32.mxu0 %vm339_vm0, %v301_v35 }
  0x73   : > { %1258 = vmatmul.mubr.msk.f32.gmra.mrb[10].mxu0 %vm339_vm0, %v302_v36 }
  0x74   : > { %1260 = vmatprep.mubr.msk.f32.mxu0 %vm339_vm0, %v303_v37 }
  0x77   : > { %1261 = vmatmul.mubr.msk.f32.gmra.mrb[12].mxu0 %vm339_vm0, %v304_v38 }
  0x78   : > { %1263 = vmatprep.mubr.msk.f32.mxu0 %vm339_vm0, %v305_v39 }
  0x7b   : > { %1264 = vmatmul.mubr.msk.f32.gmra.mrb[14].mxu0 %vm339_vm0, %v306_v40 }
 0x132   : > { %v1244_v41 = vpop.f32.mrb[0].mxu0 }
 0x133   : > { %v502_v42 = vpop.f32.mrb[1].mxu0  ;;  %v1851_v46 = vmul.f32 0.125, %v1244_v41 }
 0x134   : > { %v1848_v43 = vmul.f32 0.125, %v502_v42 }
 0x136   : > { %597 = vmax.xlane.f32.xlu0 %v1848_v43  ;;  %v1247_v44 = vpop.f32.mrb[2].mxu0 }
 0x137   : > { %v512_v45 = vpop.f32.mrb[3].mxu0  ;;  %v1857_v50 = vmul.f32 0.125, %v1247_v44 }
 0x138   : > { %v1853_v47 = vmul.f32 0.125, %v512_v45 }
 0x13a   : > { %599 = vmax.xlane.f32.xlu0 %v1851_v46  ;;  %601 = vmax.xlane.f32.xlu1 %v1853_v47  ;;  %v1250_v48 = vpop.f32.mrb[4].mxu0 }
 0x13b   : > { %v522_v49 = vpop.f32.mrb[5].mxu0  ;;  %v1863_v54 = vmul.f32 0.125, %v1250_v48 }
 0x13c   : > { %v1859_v51 = vmul.f32 0.125, %v522_v49 }
 0x13e   : > { %603 = vmax.xlane.f32.xlu1 %v1857_v50  ;;  %605 = vmax.xlane.f32.xlu0 %v1859_v51  ;;  %v1253_v52 = vpop.f32.mrb[6].mxu0 }
 0x13f   : > { %v532_v53 = vpop.f32.mrb[7].mxu0  ;;  %v1869_v58 = vmul.f32 0.125, %v1253_v52 }
 0x140   : > { %v1865_v55 = vmul.f32 0.125, %v532_v53 }
 0x142   : > { %607 = vmax.xlane.f32.xlu1 %v1863_v54  ;;  %609 = vmax.xlane.f32.xlu0 %v1865_v55  ;;  %v1256_v56 = vpop.f32.mrb[8].mxu0 }
 0x143   : > { %v542_v57 = vpop.f32.mrb[9].mxu0  ;;  %v1875_v62 = vmul.f32 0.125, %v1256_v56 }
 0x144   : > { %v1871_v59 = vmul.f32 0.125, %v542_v57 }
 0x146   : > { %611 = vmax.xlane.f32.xlu1 %v1869_v58  ;;  %613 = vmax.xlane.f32.xlu0 %v1871_v59  ;;  %v1259_v60 = vpop.f32.mrb[10].mxu0 }
 0x147   : > { %v552_v61 = vpop.f32.mrb[11].mxu0  ;;  %v1881_v2 = vmul.f32 0.125, %v1259_v60 }
 0x148   : > { %v1877_v63 = vmul.f32 0.125, %v552_v61 }
 0x14a   : > { %615 = vmax.xlane.f32.xlu1 %v1875_v62  ;;  %617 = vmax.xlane.f32.xlu0 %v1877_v63  ;;  %v1262_v0 = vpop.f32.mrb[12].mxu0 }
 0x14b   : > { %v562_v1 = vpop.f32.mrb[13].mxu0  ;;  %v1887_v6 = vmul.f32 0.125, %v1262_v0 }
 0x14c   : > { %v1883_v3 = vmul.f32 0.125, %v562_v1 }
 0x14e   : > { %619 = vmax.xlane.f32.xlu1 %v1881_v2  ;;  %621 = vmax.xlane.f32.xlu0 %v1883_v3  ;;  %v1265_v4 = vpop.f32.mrb[14].mxu0 }
 0x14f   : > { %v572_v5 = vpop.f32.mrb[15].mxu0  ;;  %v1893_v8 = vmul.f32 0.125, %v1265_v4 }
 0x150   : > { %v1889_v7 = vmul.f32 0.125, %v572_v5 }
 0x152   : > { %623 = vmax.xlane.f32.xlu1 %v1887_v6  ;;  %625 = vmax.xlane.f32.xlu0 %v1889_v7 }
 0x156   : > { %627 = vmax.xlane.f32.xlu1 %v1893_v8 }
 0x1c3   : > { %v598_v21 = vpop.xlane.xlu0 %597 }
 0x1c4   : > { %v629_v22 = vsub.f32 %v1848_v43, %v598_v21 }
 0x1c6   : > { %v645_v23 = vmul.f32 1.442695, %v629_v22 }
 0x1c7   : > { %v600_v24 = vpop.xlane.xlu0 %599  ;;  %v602_v25 = vpop.xlane.xlu1 %601 }
 0x1c8   : > { %1475 = vpow2.f32 %v645_v23  ;;  %v630_v26 = vsub.f32 %v1851_v46, %v600_v24  ;;  %v631_v27 = vsub.f32 %v1853_v47, %v602_v25  ;;  %v336_v23 = vld [vmem:[%s1901_s12 + $0x68] sm:$0xff] }
 0x1ca   : > { %v647_v28 = vmul.f32 1.442695, %v630_v26  ;;  %v649_v29 = vmul.f32 1.442695, %v631_v27  ;;  %v337_v27 = vld [vmem:[%s1901_s12 + $0x70] sm:$0xff] }
 0x1cb   : > { %v604_v30 = vpop.xlane.xlu1 %603  ;;  %v606_v31 = vpop.xlane.xlu0 %605 }
 0x1cc   : > { %1477 = vpow2.f32 %v647_v28  ;;  %v632_v32 = vsub.f32 %v1857_v50, %v604_v30  ;;  %v633_v33 = vsub.f32 %v1859_v51, %v606_v31  ;;  %v338_v28 = vld [vmem:[%s1901_s12 + $0x78] sm:$0xff] }
 0x1cd   : > { %1479 = vpow2.f32 %v649_v29  ;;  %v1398_v29 = vpack.c.bf16 %v338_v28, %v337_v27 }
 0x1ce   : > { %v651_v34 = vmul.f32 1.442695, %v632_v32  ;;  %v653_v35 = vmul.f32 1.442695, %v633_v33 }
 0x1cf   : > { %v608_v36 = vpop.xlane.xlu1 %607  ;;  %v610_v37 = vpop.xlane.xlu0 %609 }
 0x1d0   : > { %1481 = vpow2.f32 %v651_v34  ;;  %v634_v38 = vsub.f32 %v1863_v54, %v608_v36  ;;  %v635_v39 = vsub.f32 %v1865_v55, %v610_v37 }
 0x1d1   : > { %1483 = vpow2.f32 %v653_v35 }
 0x1d2   : > { %v1918_v40 = vpop.eup %1475  ;;  %v655_v41 = vmul.f32 1.442695, %v634_v38  ;;  %v657_v42 = vmul.f32 1.442695, %v635_v39 }
 0x1d3   : > { %v612_v43 = vpop.xlane.xlu1 %611  ;;  %v614_v44 = vpop.xlane.xlu0 %613  ;;  %677 = vadd.xlane.f32.xlu0 %v1918_v40 }
 0x1d4   : > { %1485 = vpow2.f32 %v655_v41  ;;  %v636_v45 = vsub.f32 %v1869_v58, %v612_v43  ;;  %v637_v46 = vsub.f32 %v1871_v59, %v614_v44 }
 0x1d5   : > { %1487 = vpow2.f32 %v657_v42 }
 0x1d6   : > { %v1923_v47 = vpop.eup %1477  ;;  %v659_v48 = vmul.f32 1.442695, %v636_v45  ;;  %v661_v49 = vmul.f32 1.442695, %v637_v46 }
 0x1d7   : > { %v1925_v50 = vpop.eup %1479  ;;  %v616_v51 = vpop.xlane.xlu1 %615  ;;  %679 = vadd.xlane.f32.xlu1 %v1923_v47 }
 0x1d8   : > { %v618_v52 = vpop.xlane.xlu0 %617  ;;  %1489 = vpow2.f32 %v659_v48  ;;  %v638_v53 = vsub.f32 %v1875_v62, %v616_v51  ;;  %681 = vadd.xlane.f32.xlu0 %v1925_v50 }
 0x1d9   : > { %v639_v54 = vsub.f32 %v1877_v63, %v618_v52  ;;  %1491 = vpow2.f32 %v661_v49 }
 0x1da   : > { %v1931_v55 = vpop.eup %1481  ;;  %v663_v56 = vmul.f32 1.442695, %v638_v53 }
 0x1db   : > { %v665_v57 = vmul.f32 1.442695, %v639_v54  ;;  %v1933_v58 = vpop.eup %1483  ;;  %v620_v59 = vpop.xlane.xlu1 %619  ;;  %683 = vadd.xlane.f32.xlu1 %v1931_v55 }
 0x1dc   : > { %v622_v60 = vpop.xlane.xlu0 %621  ;;  %1493 = vpow2.f32 %v663_v56  ;;  %v640_v61 = vsub.f32 %v1881_v2, %v620_v59  ;;  %685 = vadd.xlane.f32.xlu0 %v1933_v58 }
 0x1dd   : > { %v641_v62 = vsub.f32 %v1883_v3, %v622_v60  ;;  %1495 = vpow2.f32 %v665_v57  ;;  %v331_v3 = vld [vmem:[%s1901_s12 + $0x40] sm:$0xff] }
 0x1de   : > { %v1939_v63 = vpop.eup %1485  ;;  %v667_v0 = vmul.f32 1.442695, %v640_v61  ;;  %v1386_v12 = vpack.c.bf16 %v332_v11, %v331_v3 }
 0x1df   : > { %v669_v1 = vmul.f32 1.442695, %v641_v62  ;;  %v1941_v4 = vpop.eup %1487  ;;  %v624_v5 = vpop.xlane.xlu1 %623  ;;  %687 = vadd.xlane.f32.xlu1 %v1939_v63 }
 0x1e0   : > { %v626_v9 = vpop.xlane.xlu0 %625  ;;  %1497 = vpow2.f32 %v667_v0  ;;  %v642_v10 = vsub.f32 %v1887_v6, %v624_v5  ;;  %689 = vadd.xlane.f32.xlu0 %v1941_v4  ;;  %1387 = vmatprep.subr.bf16.mxu1 %v1386_v12 }
 0x1e1   : > { %v643_v2 = vsub.f32 %v1889_v7, %v626_v9  ;;  %1499 = vpow2.f32 %v669_v1  ;;  %1389 = vmatpush3.bf16.msra.mxu1 %v1386_v12  ;;  %v333_v7 = vld [vmem:[%s1901_s12 + $0x50] sm:$0xff] }
 0x1e2   : > { %v1949_v13 = vpop.eup %1489  ;;  %v671_v14 = vmul.f32 1.442695, %v642_v10  ;;  %v1390_v19 = vpack.c.bf16 %v334_v18, %v333_v7 }
 0x1e3   : > { %v673_v15 = vmul.f32 1.442695, %v643_v2  ;;  %v1951_v16 = vpop.eup %1491  ;;  %691 = vadd.xlane.f32.xlu1 %v1949_v13  ;;  %v628_v17 = vpop.xlane.xlu1 %627 }
 0x1e4   : > { %1501 = vpow2.f32 %v671_v14  ;;  %v644_v6 = vsub.f32 %v1893_v8, %v628_v17  ;;  %693 = vadd.xlane.f32.xlu0 %v1951_v16  ;;  %1391 = vmatprep.subr.bf16.mxu1 %v1390_v19  ;;  %v335_v8 = vld [vmem:[%s1901_s12 + $0x60] sm:$0xff]  ;;  %s2032_s12 = scalar_lea.sflag [#allocation3], %s257_s9 }
 0x1e5   : > { %1503 = vpow2.f32 %v673_v15  ;;  %1393 = vmatpush3.bf16.msra.mxu1 %v1390_v19  ;;  %v1394_v24 = vpack.c.bf16 %v336_v23, %v335_v8 }
 0x1e6   : > { %v1958_v20 = vpop.eup %1493  ;;  %v675_v21 = vmul.f32 1.442695, %v644_v6 }
 0x1e7   : > { %v1960_v22 = vpop.eup %1495  ;;  %695 = vadd.xlane.f32.xlu1 %v1958_v20  ;;  %1395 = vmatprep.subr.bf16.mxu1 %v1394_v24 }
 0x1e8   : > { %1505 = vpow2.f32 %v675_v21  ;;  %697 = vadd.xlane.f32.xlu0 %v1960_v22 }
 0x1e9   : > { %1397 = vmatpush3.bf16.msra.mxu1 %v1394_v24 }
 0x1ea   : > { %v1966_v25 = vpop.eup %1497  ;;  %1399 = vmatprep.subr.bf16.mxu1 %v1398_v29 }
 0x1eb   : > { %v1968_v26 = vpop.eup %1499  ;;  %699 = vadd.xlane.f32.xlu1 %v1966_v25 }
 0x1ec   : > { %701 = vadd.xlane.f32.xlu0 %v1968_v26 }
 0x1ed   : > { %1401 = vmatpush3.bf16.msra.mxu1 %v1398_v29 }
 0x1ee   : > { %v1974_v30 = vpop.eup %1501 }
 0x1ef   : > { %v1976_v31 = vpop.eup %1503  ;;  %703 = vadd.xlane.f32.xlu1 %v1974_v30 }
 0x1f0   : > { %705 = vadd.xlane.f32.xlu0 %v1976_v31 }
 0x1f2   : > { %v1980_v32 = vpop.eup %1505 }
 0x1f3   : > { %707 = vadd.xlane.f32.xlu1 %v1980_v32 }
 0x260   : > { %v678_v33 = vpop.xlane.xlu0 %677 }
 0x261   : > { %1507 = vrcp.f32 %v678_v33 }
 0x264   : > { %v680_v34 = vpop.xlane.xlu1 %679 }
 0x265   : > { %1509 = vrcp.f32 %v680_v34  ;;  %v682_v35 = vpop.xlane.xlu0 %681 }
 0x266   : > { %1511 = vrcp.f32 %v682_v35 }
 0x268   : > { %v684_v36 = vpop.xlane.xlu1 %683 }
 0x269   : > { %1513 = vrcp.f32 %v684_v36  ;;  %v686_v37 = vpop.xlane.xlu0 %685 }
 0x26a   : > { %1515 = vrcp.f32 %v686_v37 }
 0x26b   : > { %v1508_v38 = vpop.eup %1507 }
 0x26c   : > { %v688_v39 = vpop.xlane.xlu1 %687  ;;  %v710_v41 = vmul.f32 %v1508_v38, %v1918_v40 }
 0x26d   : > { %1517 = vrcp.f32 %v688_v39  ;;  %v690_v42 = vpop.xlane.xlu0 %689 }
 0x26e   : > { %1519 = vrcp.f32 %v690_v42  ;;  %741 = vst [vmem:[%s1987_s13] sm:$0xff] %v710_v41  ;;  %1298 = vmatprep.mubr.f32.mxu1 %v710_v41 }
 0x26f   : > { %v1510_v43 = vpop.eup %1509 }
 0x270   : > { %v1512_v44 = vpop.eup %1511  ;;  %v692_v45 = vpop.xlane.xlu1 %691  ;;  %v712_v46 = vmul.f32 %v1510_v43, %v1923_v47 }
 0x271   : > { %1521 = vrcp.f32 %v692_v45  ;;  %v694_v48 = vpop.xlane.xlu0 %693  ;;  %v714_v40 = vmul.f32 %v1512_v44, %v1925_v50 }
 0x272   : > { %1523 = vrcp.f32 %v694_v48  ;;  %742 = vst [vmem:[%s1987_s13 + $0x8] sm:$0xff] %v712_v46  ;;  %1299 = vmatmul.mubr.f32.vlgmr.msra.gmra.mrb[0].mxu1 %v712_v46 }
 0x273   : > { %v1514_v49 = vpop.eup %1513  ;;  %743 = vst [vmem:[%s1987_s13 + $0x10] sm:$0xff] %v714_v40  ;;  %1301 = vmatprep.mubr.f32.mxu1 %v714_v40 }
 0x274   : > { %v1516_v51 = vpop.eup %1515  ;;  %v696_v52 = vpop.xlane.xlu1 %695  ;;  %v716_v53 = vmul.f32 %v1514_v49, %v1931_v55 }
 0x275   : > { %1525 = vrcp.f32 %v696_v52  ;;  %v698_v54 = vpop.xlane.xlu0 %697  ;;  %v718_v47 = vmul.f32 %v1516_v51, %v1933_v58 }
 0x276   : > { %1527 = vrcp.f32 %v698_v54  ;;  %744 = vst [vmem:[%s1987_s13 + $0x18] sm:$0xff] %v716_v53  ;;  %1302 = vmatmul.mubr.f32.gmra.mrb[2].mxu1 %v716_v53 }
 0x277   : > { %v1518_v50 = vpop.eup %1517  ;;  %745 = vst [vmem:[%s1987_s13 + $0x20] sm:$0xff] %v718_v47  ;;  %1304 = vmatprep.mubr.f32.mxu1 %v718_v47 }
 0x278   : > { %v1520_v56 = vpop.eup %1519  ;;  %v700_v57 = vpop.xlane.xlu1 %699  ;;  %v720_v59 = vmul.f32 %v1518_v50, %v1939_v63 }
 0x279   : > { %1529 = vrcp.f32 %v700_v57  ;;  %v702_v60 = vpop.xlane.xlu0 %701  ;;  %v722_v55 = vmul.f32 %v1520_v56, %v1941_v4 }
 0x27a   : > { %1531 = vrcp.f32 %v702_v60  ;;  %746 = vst [vmem:[%s1987_s13 + $0x28] sm:$0xff] %v720_v59  ;;  %1305 = vmatmul.mubr.f32.gmra.mrb[4].mxu1 %v720_v59 }
 0x27b   : > { %v1522_v58 = vpop.eup %1521  ;;  %747 = vst [vmem:[%s1987_s13 + $0x30] sm:$0xff] %v722_v55  ;;  %1307 = vmatprep.mubr.f32.mxu1 %v722_v55 }
 0x27c   : > { %v1524_v61 = vpop.eup %1523  ;;  %v704_v62 = vpop.xlane.xlu1 %703  ;;  %v724_v0 = vmul.f32 %v1522_v58, %v1949_v13 }
 0x27d   : > { %1533 = vrcp.f32 %v704_v62  ;;  %v706_v1 = vpop.xlane.xlu0 %705  ;;  %v726_v63 = vmul.f32 %v1524_v61, %v1951_v16 }
 0x27e   : > { %1535 = vrcp.f32 %v706_v1  ;;  %748 = vst [vmem:[%s1987_s13 + $0x38] sm:$0xff] %v724_v0  ;;  %1308 = vmatmul.mubr.f32.gmra.mrb[6].mxu1 %v724_v0 }
 0x27f   : > { %v1526_v4 = vpop.eup %1525  ;;  %749 = vst [vmem:[%s1987_s13 + $0x40] sm:$0xff] %v726_v63  ;;  %1310 = vmatprep.mubr.f32.mxu1 %v726_v63 }
 0x280   : > { %v1528_v5 = vpop.eup %1527  ;;  %v708_v9 = vpop.xlane.xlu1 %707  ;;  %v728_v10 = vmul.f32 %v1526_v4, %v1958_v20 }
 0x281   : > { %1537 = vrcp.f32 %v708_v9  ;;  %v730_v2 = vmul.f32 %v1528_v5, %v1960_v22 }
 0x282   : > { %750 = vst [vmem:[%s1987_s13 + $0x48] sm:$0xff] %v728_v10  ;;  %1311 = vmatmul.mubr.f32.gmra.mrb[8].mxu1 %v728_v10 }
 0x283   : > { %v1530_v3 = vpop.eup %1529  ;;  %751 = vst [vmem:[%s1987_s13 + $0x50] sm:$0xff] %v730_v2  ;;  %1313 = vmatprep.mubr.f32.mxu1 %v730_v2 }
 0x284   : > { %v1532_v11 = vpop.eup %1531  ;;  %v732_v12 = vmul.f32 %v1530_v3, %v1966_v25 }
 0x285   : > { %v734_v13 = vmul.f32 %v1532_v11, %v1968_v26 }
 0x286   : > { %752 = vst [vmem:[%s1987_s13 + $0x58] sm:$0xff] %v732_v12  ;;  %1314 = vmatmul.mubr.f32.gmra.mrb[10].mxu1 %v732_v12 }
 0x287   : > { %v1534_v14 = vpop.eup %1533  ;;  %753 = vst [vmem:[%s1987_s13 + $0x60] sm:$0xff] %v734_v13  ;;  %1316 = vmatprep.mubr.f32.mxu1 %v734_v13 }
 0x288   : > { %v1536_v15 = vpop.eup %1535  ;;  %v736_v16 = vmul.f32 %v1534_v14, %v1974_v30 }
 0x289   : > { %v738_v17 = vmul.f32 %v1536_v15, %v1976_v31 }
 0x28a   : > { %754 = vst [vmem:[%s1987_s13 + $0x68] sm:$0xff] %v736_v16  ;;  %1317 = vmatmul.mubr.f32.gmra.mrb[12].mxu1 %v736_v16 }
 0x28b   : > { %v1538_v6 = vpop.eup %1537  ;;  %755 = vst [vmem:[%s1987_s13 + $0x70] sm:$0xff] %v738_v17  ;;  %1319 = vmatprep.mubr.f32.mxu1 %v738_v17 }
 0x28c   : > { %v740_v7 = vmul.f32 %v1538_v6, %v1980_v32 }
 0x28e   : > { %756 = vst [vmem:[%s1987_s13 + $0x78] sm:$0xff] %v740_v7  ;;  %1320 = vmatmul.mubr.f32.gmra.mrb[14].mxu1 %v740_v7 }
 0x28f   : > { %1552 = shalt.err (!%p1549_p7)
}
 0x290   : > { %s1553_s9 = scalar_lea.hbm %s2025_s6, 2048  ;;  %s1557_s27 = scalar_lea.hbm %s2127_s4, 8192 }
 0x291   : > { %p1554_p9 = scmp.ne.s32.totalorder %s2025_s6, %s1553_s9  ;;  %p1558_p12 = scmp.lt.u32.totalorder %s2025_s6, %s2127_s4 }
 0x292   : > { %p1559_p13 = scmp.lt.u32.totalorder %s1557_s27, %s1553_s9  ;;  %p1561_p1 = scmp.lt.u32.totalorder %s1553_s9, %s2025_s6 }
 0x293   : > { %p1555_p10 = pnand %p1554_p9, %p1714_p3 }
 0x294   : > { %p1560_p0 = por %p1559_p13, %p1558_p12 }
 0x295   : > { %p1556_p11 = pneg %p1555_p10 }
 0x296   : > { %p1562_p2 = por %p1561_p1, %p1560_p0 }
 0x298   : > { %p1563_p4 = pnand %p1562_p2, %p1556_p11 }
 0x29a   : > { %1566 = shalt.err (!%p1563_p4)
}
 0x29b   : > { %s1636_s11 = smov 128   ;;  %s1637_s19 = smov 8  }
 0x29c   : > { %1402 = dma.vmem_to_hbm [thread:$0]  (%p1714_p3), %s2028_s10, 2048, %s2025_s6, %s2032_s12, %s1636_s11, %s1636_s11, %s1637_s19  }
 0x29d   : > { %s2061_s13 = scalar_lea.vmem %s2126_s3, %s1098_s24 }
 0x345   : > { %v1300_v18 = vpop.f32.mrb[0].mxu1 }
 0x346   : > { %903 = vst.msk [vmem:[%s2061_s13 + $0x8] sm:$0xff] %vm339_vm0, %v1300_v18  ;;  %v823_v19 = vpop.f32.mrb[1].mxu1 }
 0x347   : > { %902 = vst.msk [vmem:[%s2061_s13] sm:$0xff] %vm339_vm0, %v823_v19 }
 0x349   : > { %v1303_v20 = vpop.f32.mrb[2].mxu1 }
 0x34a   : > { %905 = vst.msk [vmem:[%s2061_s13 + $0x18] sm:$0xff] %vm339_vm0, %v1303_v20  ;;  %v833_v21 = vpop.f32.mrb[3].mxu1 }
 0x34b   : > { %904 = vst.msk [vmem:[%s2061_s13 + $0x10] sm:$0xff] %vm339_vm0, %v833_v21 }
 0x34d   : > { %v1306_v22 = vpop.f32.mrb[4].mxu1 }
 0x34e   : > { %907 = vst.msk [vmem:[%s2061_s13 + $0x28] sm:$0xff] %vm339_vm0, %v1306_v22  ;;  %v843_v8 = vpop.f32.mrb[5].mxu1 }
 0x34f   : > { %906 = vst.msk [vmem:[%s2061_s13 + $0x20] sm:$0xff] %vm339_vm0, %v843_v8 }
 0x351   : > { %v1309_v23 = vpop.f32.mrb[6].mxu1 }
 0x352   : > { %909 = vst.msk [vmem:[%s2061_s13 + $0x38] sm:$0xff] %vm339_vm0, %v1309_v23  ;;  %v853_v24 = vpop.f32.mrb[7].mxu1 }
 0x353   : > { %908 = vst.msk [vmem:[%s2061_s13 + $0x30] sm:$0xff] %vm339_vm0, %v853_v24 }
 0x355   : > { %v1312_v25 = vpop.f32.mrb[8].mxu1 }
 0x356   : > { %911 = vst.msk [vmem:[%s2061_s13 + $0x48] sm:$0xff] %vm339_vm0, %v1312_v25  ;;  %v863_v26 = vpop.f32.mrb[9].mxu1 }
 0x357   : > { %910 = vst.msk [vmem:[%s2061_s13 + $0x40] sm:$0xff] %vm339_vm0, %v863_v26 }
 0x359   : > { %v1315_v27 = vpop.f32.mrb[10].mxu1 }
 0x35a   : > { %913 = vst.msk [vmem:[%s2061_s13 + $0x58] sm:$0xff] %vm339_vm0, %v1315_v27  ;;  %v873_v28 = vpop.f32.mrb[11].mxu1 }
 0x35b   : > { %912 = vst.msk [vmem:[%s2061_s13 + $0x50] sm:$0xff] %vm339_vm0, %v873_v28 }
 0x35d   : > { %v1318_v29 = vpop.f32.mrb[12].mxu1 }
 0x35e   : > { %915 = vst.msk [vmem:[%s2061_s13 + $0x68] sm:$0xff] %vm339_vm0, %v1318_v29  ;;  %v883_v30 = vpop.f32.mrb[13].mxu1 }
 0x35f   : > { %914 = vst.msk [vmem:[%s2061_s13 + $0x60] sm:$0xff] %vm339_vm0, %v883_v30 }
 0x361   : > { %v1321_v31 = vpop.f32.mrb[14].mxu1 }
 0x362   : > { %917 = vst.msk [vmem:[%s2061_s13 + $0x78] sm:$0xff] %vm339_vm0, %v1321_v31  ;;  %v893_v32 = vpop.f32.mrb[15].mxu1 }
 0x363   : > { %916 = vst.msk [vmem:[%s2061_s13 + $0x70] sm:$0xff] %vm339_vm0, %v893_v32 }
 0x364 PF: > { %p1408_p3 = scmp.ge.s32.totalorder %s1633_s22, 2  ;;  %s974_s28 = sand.u32 1, %s1605_s15  }
 0x365   : > { %s975_s18 = scalar_lea.sflag [#allocation3], %s974_s28 }
 0x366   : > { %p1405_p5 = pnand %p1408_p3, %p1723_p8 }
 0x368   : > { %1600 = dma.done.wait (!%p1405_p5), %s975_s18, 2048  }
 0x369   : > { %1602 = vsyncadd (!%p1405_p5), %s975_s18, 4294965248  ;;  %s18_s22 = sadd.s32 1, %s1633_s22   ;;  %s2132_s15 = smov %s1609_s16 }
 0x36a   : > { %p15_p6 = scmp.ge.s32.totalorder %s18_s22, 6   ;;  %s2133_s16 = smov %s1613_s17 }
 0x36b   : > { %s2134_s17 = smov %s1732_s7  ;;  %s2135_s18 = smov %s1625_s20 }
 0x36c   : > { %s2136_s19 = smov %s1629_s21  ;;  %s2137_s20 = smov %s2140_s25 }
 0x36d   : > { %s2138_s21 = smov %s2144_s26  ;;  %17 = sbr.rel (!%p15_p6) target bundleno = 5 (0x5), region = 85 }
 0x374   :  { %980 = vsyncpa [#allocation3], 1 }
 0x375   :  { %982 = vsyncpa [#allocation3 + $0x1], 1 }

</bundles_post_ra>
